<compile_context>
chip_gen: v5e
topology: v5e:2x2
jax: 0.10.0
libtpu: 0.0.40
codegen_flags: <defaults>
</compile_context>

<pallas_src>
import functools

import jax
import jax.numpy as jnp
from jax.experimental import pallas as pl
from jax.experimental.pallas import tpu as pltpu


# Padded, double-buffered VMEM footprint target for one grid step.  Stays well
# under the smallest default scoped-VMEM limit (16 MiB on v5e) and far under
# v7x's 64 MiB physical VMEM.
_VMEM_BUDGET = 12 * 1024 * 1024


def _round_up(x: int, m: int) -> int:
    return -(-x // m) * m


def _num_tensorcores_per_chip() -> int:
    """Best-effort detection of 2-TensorCore ("megacore") chips (v4/v5p/v7x)."""
    try:
        kind = getattr(jax.devices()[0], "device_kind", "").lower()
        if ("v4" in kind) or ("v5p" in kind) or ("v7" in kind):
            return 2
    except Exception:
        pass
    return 1


def _choose_tiling(B: int, HW: int, c_out: int, itemsize: int):
    """Pick (batch tile bt, lane tile hw_t) from the padded VMEM footprint."""
    # Sublane granularity rows pad to in VMEM: f32 -> 8, bf16 -> 16, int8 -> 32.
    sub = 8 * max(1, 4 // itemsize)

    def footprint(bt, hw_t):
        rows = (_round_up(c_out, sub) + _round_up(bt, sub)
                + _round_up(bt * c_out, sub))
        return 2 * rows * hw_t * itemsize          # x2 = double-buffered

    # Lane tile: prefer the full flattened spatial extent (fully contiguous
    # HBM<->VMEM DMA); only tile it (multiples of 128 lanes) when even a
    # single batch element would blow the budget (very large images).
    min_bt = B if B < sub else sub
    if footprint(min_bt, HW) <= _VMEM_BUDGET:
        hw_t = HW
    else:
        rows = (_round_up(c_out, sub) + _round_up(min_bt, sub)
                + _round_up(min_bt * c_out, sub))
        hw_t = max(128, (_VMEM_BUDGET // (2 * rows * itemsize)) // 128 * 128)
        hw_t = min(hw_t, HW)

    # Batch tile: largest size whose padded footprint fits.  Valid sizes are
    # multiples of the sublane granularity (dense (8,128) block shapes) or the
    # full batch (full-dim blocks are always legal).
    valid_bts = sorted({B} | set(range(sub, B + 1, sub)))
    bt = min_bt
    for cand in valid_bts:
        if cand <= B and footprint(cand, hw_t) <= _VMEM_BUDGET:
            bt = max(bt, cand)

    # Megacore balancing (v7x-style 2-TC chips only): prefer an even number of
    # parallel grid steps so both TensorCores get equal shards.  Never force a
    # split on single-TC v5e/v6e.
    n_spatial = pl.cdiv(HW, hw_t)
    n_batch = pl.cdiv(B, bt)
    if _num_tensorcores_per_chip() >= 2 and (n_spatial * n_batch) % 2 == 1:
        for cand in sorted((v for v in valid_bts if v < bt), reverse=True):
            if (pl.cdiv(B, cand) * n_spatial) % 2 == 0:
                bt = cand
                break

    return bt, hw_t


def _add_coords_kernel(coords_ref, img_ref, out_ref, *, bt: int, coord_c: int):
    """Write one (bt batch x hw_t spatial) tile of the CoordConv output.

    coords_ref: (coord_c, hw_t)        precomputed [y, x, (r)] planes
    img_ref:    (bt, hw_t)             image rows, lane-dense
    out_ref:    (bt * (coord_c+1), hw_t) flat NCHW rows; per batch element the
                consecutive rows are [y, x, (r), img].
    """
    c_out = coord_c + 1
    coords = coords_ref[...]           # resident; same dtype as the output

    def write_one(b, base):
        out_ref[pl.ds(base, coord_c), :] = coords
        out_ref[pl.ds(base + coord_c, 1), :] = img_ref[pl.ds(b, 1), :]

    if bt <= 16:
        # Fully static slices for small batch tiles (best LLO scheduling).
        for b in range(bt):
            write_one(b, b * c_out)
    else:
        def body(b, carry):
            write_one(b, b * c_out)
            return carry
        jax.lax.fori_loop(0, bt, body, 0)


def add_coordinates(img: jax.Array, with_r: bool = False) -> jax.Array:
    """Pallas implementation of AddCoordinates.forward.

    img: (B, 1, H, W) NCHW single-channel image.
    returns: (B, 2 + with_r + 1, H, W), channels = [y, x, (r), img].
    """
    B, C_in, H, W = img.shape
    if C_in != 1:
        raise ValueError("AddCoordinates expects a single-channel image (B, 1, D, D)")
    if H < 2 or W < 2:
        raise ValueError("H and W must be > 1 (normalisation divides by H-1, W-1)")

    coord_c = 2 + int(with_r)
    c_out = coord_c + 1
    HW = H * W
    itemsize = jnp.dtype(img.dtype).itemsize

    # --- Coordinate planes (tiny: coord_c*H*W elements), built once in the
    # wrapper with exactly the reference math, then streamed into the kernel
    # as a VMEM-resident input (block index constant along the batch axis).
    y = 2.0 * jnp.arange(H, dtype=jnp.float32)[:, None] / (H - 1.0) - 1.0
    y = jnp.broadcast_to(y, (H, W))
    x = 2.0 * jnp.arange(W, dtype=jnp.float32)[None, :] / (W - 1.0) - 1.0
    x = jnp.broadcast_to(x, (H, W))
    coords = jnp.stack((y, x), axis=0)
    if with_r:
        r = jnp.sqrt(y * y + x * x)
        r = r / jnp.max(r)
        coords = jnp.concatenate((coords, r[None]), axis=0)
    coords_flat = coords.reshape(coord_c, HW).astype(img.dtype)

    # --- Free (metadata-only) views of contiguous NCHW buffers: image as
    # (B, HW), output as (B*c_out, HW).  Both blocks are lane- and
    # sublane-dense; the output rows of one batch element never straddle a
    # block boundary (block row size is a multiple of c_out).
    img_flat = img.reshape(B, HW)

    bt, hw_t = _choose_tiling(B, HW, c_out, itemsize)
    grid = (pl.cdiv(HW, hw_t), pl.cdiv(B, bt))     # spatial outer, batch inner

    kernel = functools.partial(_add_coords_kernel, bt=bt, coord_c=coord_c)

    cost = pl.CostEstimate(
        flops=0,
        transcendentals=0,
        bytes_accessed=int((B * HW + B * c_out * HW + coord_c * HW) * itemsize),
    )

    out_flat = pl.pallas_call(
        kernel,
        out_shape=jax.ShapeDtypeStruct((B * c_out, HW), img.dtype),
        grid_spec=pltpu.PrefetchScalarGridSpec(
            num_scalar_prefetch=0,
            grid=grid,
            in_specs=[
                # coords: constant along the (inner) batch axis -> DMA'd once
                # per spatial tile and kept resident in VMEM.
                pl.BlockSpec((coord_c, hw_t), lambda s, b: (0, s)),
                pl.BlockSpec((bt, hw_t), lambda s, b: (b, s)),
            ],
            out_specs=pl.BlockSpec((bt * c_out, hw_t), lambda s, b: (b, s)),
        ),
        compiler_params=pltpu.CompilerParams(
            dimension_semantics=("parallel", "parallel"),
        ),
        cost_estimate=cost,
    )(coords_flat, img_flat)

    return out_flat.reshape(B, c_out, H, W)


def add_coordinates_ref(img: jax.Array, with_r: bool = False) -> jax.Array:
    """Pure-JAX reference mirroring the PyTorch module."""
    B, _, H, W = img.shape
    y = 2.0 * jnp.arange(H, dtype=jnp.float32)[:, None] / (H - 1.0) - 1.0
    y = jnp.broadcast_to(y, (H, W))
    x = 2.0 * jnp.arange(W, dtype=jnp.float32)[None, :] / (W - 1.0) - 1.0
    x = jnp.broadcast_to(x, (H, W))
    coords = jnp.stack((y, x), axis=0)
    if with_r:
        r = jnp.sqrt(y**2 + x**2)
        r = r / jnp.max(r)
        coords = jnp.concatenate((coords, r[None]), axis=0)
    coords = jnp.broadcast_to(coords[None], (B,) + coords.shape)
    return jnp.concatenate((coords.astype(img.dtype), img), axis=1)


if __name__ == "__main__":
    key = jax.random.PRNGKey(0)
    ok = True
    for (B, H, W) in ((2, 16, 16), (4, 12, 12)):
        img = jax.random.normal(key, (B, 1, H, W), dtype=jnp.float32)
        for with_r in (False, True):
            out = jax.block_until_ready(add_coordinates(img, with_r=with_r))
            ref = add_coordinates_ref(img, with_r=with_r)
            assert out.shape == (B, 3 + int(with_r), H, W), out.shape
            if not jnp.allclose(out, ref, atol=1e-6, rtol=1e-6):
                ok = False
    if ok:
        print("KERNEL_OK")
</pallas_src>

<mosaic_0001>
module attributes {stable_mosaic.version = 11 : i64} {
  func.func @_add_coords_kernel(%arg0: i32, %arg1: i32, %arg2: memref<2x256xf32, #tpu.memory_space<vmem>>, %arg3: memref<2x256xf32, #tpu.memory_space<vmem>>, %arg4: memref<6x256xf32, #tpu.memory_space<vmem>>) attributes {dimension_semantics = [#tpu.dimension_semantics<parallel>, #tpu.dimension_semantics<parallel>], iteration_bounds = array<i64: 1, 1>, scalar_prefetch = 0 : i64, scratch_operands = 0 : i64, tpu.core_type = #tpu.core_type<tc>, window_params = [{transform_indices = @transform_0, window_bounds = array<i64: 2, 256>}, {transform_indices = @transform_1, window_bounds = array<i64: 2, 256>}, {transform_indices = @transform_2, window_bounds = array<i64: 6, 256>}]} {
    %c0 = arith.constant 0 : index
    %c0_0 = arith.constant 0 : index
    %0 = vector.load %arg2[%c0, %c0_0] : memref<2x256xf32, #tpu.memory_space<vmem>>, vector<2x256xf32>
    %c0_1 = arith.constant 0 : index
    %c0_2 = arith.constant 0 : index
    %1 = vector.load %arg4[%c0_1, %c0_2] : memref<6x256xf32, #tpu.memory_space<vmem>>, vector<2x256xf32>
    tpu.vector_store %arg4[%c0_1, %c0_2], %0 {strides = array<i32>} : memref<6x256xf32, #tpu.memory_space<vmem>>, vector<2x256xf32>,
    %c0_3 = arith.constant 0 : index
    %c0_4 = arith.constant 0 : index
    %2 = vector.load %arg3[%c0_3, %c0_4] : memref<2x256xf32, #tpu.memory_space<vmem>>, vector<1x256xf32>
    %c2 = arith.constant 2 : index
    %c0_5 = arith.constant 0 : index
    %3 = vector.load %arg4[%c2, %c0_5] : memref<6x256xf32, #tpu.memory_space<vmem>>, vector<1x256xf32>
    tpu.vector_store %arg4[%c2, %c0_5], %2 {strides = array<i32>} : memref<6x256xf32, #tpu.memory_space<vmem>>, vector<1x256xf32>,
    %c3 = arith.constant 3 : index
    %c0_6 = arith.constant 0 : index
    %4 = vector.load %arg4[%c3, %c0_6] : memref<6x256xf32, #tpu.memory_space<vmem>>, vector<2x256xf32>
    tpu.vector_store %arg4[%c3, %c0_6], %0 {strides = array<i32>} : memref<6x256xf32, #tpu.memory_space<vmem>>, vector<2x256xf32>,
    %c1 = arith.constant 1 : index
    %c0_7 = arith.constant 0 : index
    %5 = vector.load %arg3[%c1, %c0_7] : memref<2x256xf32, #tpu.memory_space<vmem>>, vector<1x256xf32>
    %c5 = arith.constant 5 : index
    %c0_8 = arith.constant 0 : index
    %6 = vector.load %arg4[%c5, %c0_8] : memref<6x256xf32, #tpu.memory_space<vmem>>, vector<1x256xf32>
    tpu.vector_store %arg4[%c5, %c0_8], %5 {strides = array<i32>} : memref<6x256xf32, #tpu.memory_space<vmem>>, vector<1x256xf32>,
    return
  }
  func.func @transform_0(%arg0: i32, %arg1: i32) -> (i32, i32) {
    %c0_i32 = arith.constant 0 : i32
    %c0_i32_0 = arith.constant 0 : i32
    return %c0_i32, %arg0 : i32, i32
  }
  func.func @transform_1(%arg0: i32, %arg1: i32) -> (i32, i32) {
    %c0_i32 = arith.constant 0 : i32
    return %arg1, %arg0 : i32, i32
  }
  func.func @transform_2(%arg0: i32, %arg1: i32) -> (i32, i32) {
    %c0_i32 = arith.constant 0 : i32
    return %arg1, %arg0 : i32, i32
  }
}

</mosaic_0001>

<bundles_post_ra>
// kernel: tpu_custom_call.1
= control target key start
LH: loop header
LB: loop body
LE: loop exit
PB: predicated region body
PF: predicated region fallthrough
CT: control target
= control target key end

     0   :  { %7 = vsyncpa [#allocation3], 0  ;;  %s197_s0 = inlined_call_operand.hbm [shape: f32[2,256], index: 0, kind: input, shape index: {}]   ;;  %s198_s1 = inlined_call_operand.hbm [shape: f32[2,256], index: 1, kind: input, shape index: {}]   ;;  %s199_s2 = inlined_call_operand.hbm [shape: f32[6,256], index: 2, kind: output, shape index: {}]  }
   0x1   :  { %8 = vsyncpa [#allocation6], 0 }
   0x2   :  { %9 = vsyncpa [#allocation4], 0  ;;  %s15_s11 = sshll.u32 %s197_s0, 4  ;;  %s170_s12 = smov [#allocation2]   ;;  %s16_s11 = int_to_ptr.hbm [resolvable:$true] %s15_s11 }
   0x3   :  { %s17_s13 = sshll.u32 %s170_s12, 4  ;;  %s26_s16 = sshll.u32 %s198_s1, 4  ;;  %s18_s13 = int_to_ptr.vmem [resolvable:$true] %s17_s13  ;;  %s27_s16 = int_to_ptr.hbm [resolvable:$true] %s26_s16 }
   0x4   :  { %20 = dma.hbm_to_vmem [thread:$0]  %s16_s11, 64, %s18_s13, [#allocation3]  }
   0x5   :  { %s171_s17 = smov [#allocation5]  }
   0x6   :  { %s28_s18 = sshll.u32 %s171_s17, 4  ;;  %s29_s18 = int_to_ptr.vmem [resolvable:$true] %s28_s18 }
   0x7   :  { %31 = dma.hbm_to_vmem [thread:$0]  %s27_s16, 64, %s29_s18, [#allocation6]  }
   0x8   :  { %164 = dma.done.wait [#allocation3], 64  }
   0x9   :  { %165 = vsyncadd [#allocation3], 4294967232 }
   0xa   :  { %166 = dma.done.wait [#allocation6], 64  }
   0xb   :  { %167 = vsyncadd [#allocation6], 4294967232  ;;  %v50_v0 = vlaneseq  ;;  %v40_v1 = vld [vmem:[#allocation2] sm:$0xf]  ;;  %s172_s0 = smov [#allocation7]   ;;  %s78_s21 = sshll.u32 %s199_s2, 4  ;;  %s79_s21 = int_to_ptr.hbm [resolvable:$true] %s78_s21 }
   0xc   :  { %v49_v2 = vld [vmem:[#allocation5] ss:$2 sm:$0x3]  ;;  %42 = vst [vmem:[#allocation1] ss:$4 sm:$0xff] %v40_v1  ;;  %s76_s1 = sshll.u32 %s172_s0, 4  ;;  %s77_s1 = int_to_ptr.vmem [resolvable:$true] %s76_s1 }
   0xd   :  { %vm52_vm0 = vcmp.lt.s32.totalorder %v50_v0, 256  ;;  %v67_v3 = vld [vmem:[#allocation5 + $0x1] ss:$2 sm:$0x3] }
   0xe   :  { %55 = vst.msk [vmem:[#allocation7 + $0x2] ss:$8 sm:$0x3] %vm52_vm0, %v49_v2 }
   0xf   :  { %69 = vst.msk [vmem:[#allocation7 + $0x5] ss:$8 sm:$0x3] %vm52_vm0, %v67_v3 }
  0x13   :  { %v43_v4 = vld.sshfl [vmem:[#allocation1] sm:$0xff pattern:$0x73625140]  ;;  %v44_v5 = vld.sshfl [vmem:[#allocation1 + $0x8] sm:$0xff pattern:$0x73625140] }
  0x14   :  { %47 = vst [vmem:[#allocation7] sm:$0x3] %v43_v4 }
  0x15   :  { %48 = vst [vmem:[#allocation7 + $0x8] sm:$0x3] %v44_v5 }
  0x16   :  { %57 = vst [vmem:[#allocation1] ss:$4 sm:$0xff] %v40_v1 }
  0x1d   :  { %v58_v6 = vld.sshfl [vmem:[#allocation1] sm:$0xff pattern:$0x73625140]  ;;  %v59_v7 = vld.sshfl [vmem:[#allocation1 + $0x8] sm:$0xff pattern:$0x73625140] }
  0x1e   :  { %v60_v8 = vrot.slane %v58_v6, 5  ;;  %v61_v9 = vrot.slane %v59_v7, 5 }
  0x20   :  { %64 = vst [vmem:[#allocation7] sm:$0x18] %v60_v8 }
  0x21   :  { %65 = vst [vmem:[#allocation7 + $0x8] sm:$0x18] %v61_v9 }
  0x22   :  { %81 = dma.vmem_to_hbm [thread:$0]  %s77_s1, 256, %s79_s21, [#allocation4]  }
  0x23   :  { %168 = dma.done.wait [#allocation4], 256  }
  0x24   :  { %169 = vsyncadd [#allocation4], 4294967040 }
  0x25   :  { %86 = vsyncpa [#allocation3], 1 }
  0x26   :  { %87 = vsyncpa [#allocation6], 1 }
  0x27   :  { %88 = vsyncpa [#allocation4], 1 }

</bundles_post_ra>
